<compile_context>
chip_gen: v5e
topology: v5e:2x2
jax: 0.10.0
libtpu: 0.0.40
codegen_flags: <defaults>
</compile_context>

<pallas_src>
import inspect

import jax
import jax.numpy as jnp
from jax.experimental import pallas as pl
from jax.experimental.pallas import tpu as pltpu


def _round_up(x, m):
    return (x + m - 1) // m * m


def _blockspec_supports_pipeline_mode():
    try:
        return hasattr(pl, "Buffered") and (
            "pipeline_mode" in inspect.signature(pl.BlockSpec).parameters)
    except Exception:
        return False


def im_attention_kernel(adj_ref, feat_ref, normr_ref, o_ref):
    """One (dst-tile, feat-tile, src-tile) step of out = D_r^-1/2 A D_l^-1/2 X."""
    k = pl.program_id(2)

    # adj streams in as int8 (0/1 exact); upcast to the matmul dtype right
    # before the MXU.  feat arrives already prescaled by norm_l and cast.
    partial = jnp.dot(adj_ref[...].astype(feat_ref.dtype), feat_ref[...],
                      preferred_element_type=jnp.float32)            # (tm, tf) f32

    # Accumulate directly into the resident f32 output tile (its block index
    # is constant across k) -> no separate VMEM accumulator scratch needed.
    @pl.when(k == 0)
    def _init():
        o_ref[...] = partial

    @pl.when(k > 0)
    def _acc():
        o_ref[...] += partial

    @pl.when(k == pl.num_programs(2) - 1)
    def _finish():
        o_ref[...] = (o_ref[...] * normr_ref[...]).astype(o_ref.dtype)


def prepare_graph(adj):
    """Per-graph (static) preprocessing: int8 adjacency + rsqrt degree norms.

    adj: (N_dst, N_src) dense 0/1 adjacency, adj[dst, src] = 1 iff edge src->dst.
    Returns (adj_int8, norm_l (N_src, 1) f32, norm_r (N_dst, 1) f32).
    Call ONCE per graph and reuse across forward steps (the graph is static).
    """
    adj_f = adj.astype(jnp.float32)
    deg_o = jnp.maximum(jnp.sum(adj_f, axis=0), 1.0)   # out-degree per source
    deg_i = jnp.maximum(jnp.sum(adj_f, axis=1), 1.0)   # in-degree  per dest
    norm_l = jax.lax.rsqrt(deg_o).reshape(-1, 1)
    norm_r = jax.lax.rsqrt(deg_i).reshape(-1, 1)
    adj_i8 = adj.astype(jnp.int8)                      # 0/1 -> exact, 4x smaller
    return adj_i8, norm_l, norm_r


def im_attention_prepared(graph, feat, *, block_dst=512, block_src=512,
                          block_feat=2048, matmul_dtype=jnp.bfloat16):
    """Per-step path: symmetric-normalized aggregation with a prepared graph."""
    adj_i8, norm_l, norm_r = graph
    assert block_dst % 8 == 0 and block_src % 128 == 0 and block_feat % 128 == 0
    n_dst, n_src = adj_i8.shape
    n, f = feat.shape
    assert n_src == n and norm_l.shape[0] == n_src and norm_r.shape[0] == n_dst

    # ---- tile sizes ---------------------------------------------------------
    # Cover the feature dim in a single pass whenever block_feat allows: the
    # N^2 adjacency is the dominant HBM stream and is re-read f_p/tf times.
    tm = min(block_dst, _round_up(n_dst, 8))
    tk = min(block_src, _round_up(n_src, 128))
    tf = min(block_feat, _round_up(f, 128))

    # v7x has two TensorCores: keep >=2 parallel tiles to shard across them
    # when the dst axis is big enough.  (On single-TC v5e/v6e this only adds
    # one ~0.35us grid step -- negligible.)
    if (_round_up(n_dst, 8) // tm) * (_round_up(f, 128) // tf) < 2 and n_dst >= 256:
        tm = max(8, _round_up((tm + 1) // 2, 8))

    n_dst_p = _round_up(n_dst, tm)
    n_src_p = _round_up(n_src, tk)
    f_p = _round_up(f, tf)

    # ---- per-step operand prep ---------------------------------------------
    # Prescale feat by the source norm in f32, cast once, pad with zeros
    # (exact in bf16).  adj is padded as int8 (cheap, no dtype conversion).
    feat_s = (feat.astype(jnp.float32) * norm_l).astype(matmul_dtype)
    feat_p = jnp.pad(feat_s, ((0, n_src_p - n_src), (0, f_p - f)))
    adj_p = jnp.pad(adj_i8, ((0, n_dst_p - n_dst), (0, n_src_p - n_src)))
    normr_p = jnp.pad(norm_r.astype(jnp.float32), ((0, n_dst_p - n_dst), (0, 0)))

    grid = (n_dst_p // tm, f_p // tf, n_src_p // tk)
    g_i, g_j, g_k = grid

    # Deeper pipelining on the adjacency stream when the reduction is long.
    adj_spec_kwargs = {}
    n_adj_buf = 2
    if g_k >= 3 and _blockspec_supports_pipeline_mode():
        adj_spec_kwargs["pipeline_mode"] = pl.Buffered(3)
        n_adj_buf = 3
    adj_spec = pl.BlockSpec((tm, tk), lambda i, j, k: (i, k), **adj_spec_kwargs)

    # Truthful re-read accounting: adj streamed once per feat tile, feat once
    # per dst tile; the f32 output is resident across k and written once.
    cost = pl.CostEstimate(
        flops=2 * n_dst_p * n_src_p * f_p + n_dst_p * f_p,
        transcendentals=0,
        bytes_accessed=(adj_p.size * adj_p.dtype.itemsize * g_j
                        + feat_p.size * feat_p.dtype.itemsize * g_i
                        + normr_p.size * 4 * g_j
                        + n_dst_p * f_p * 4),
    )

    # Explicit VMEM budget (double-buffered inputs + resident f32 output).
    vmem_est = (n_adj_buf * tm * tk * adj_p.dtype.itemsize
                + 2 * tk * tf * feat_p.dtype.itemsize
                + 2 * tm * 4
                + 2 * tm * tf * 4)
    vmem_limit = int(min(128 * 1024 * 1024, max(32 * 1024 * 1024, 2 * vmem_est)))

    out_p = pl.pallas_call(
        im_attention_kernel,
        out_shape=jax.ShapeDtypeStruct((n_dst_p, f_p), jnp.float32),
        grid_spec=pltpu.PrefetchScalarGridSpec(
            num_scalar_prefetch=0,
            grid=grid,
            in_specs=[
                adj_spec,                                          # adj[dst, src] int8
                pl.BlockSpec((tk, tf), lambda i, j, k: (k, j)),    # prescaled feat
                pl.BlockSpec((tm, 1), lambda i, j, k: (i, 0)),     # norm_r per dst
            ],
            out_specs=pl.BlockSpec((tm, tf), lambda i, j, k: (i, j)),
        ),
        compiler_params=pltpu.CompilerParams(
            dimension_semantics=("parallel", "parallel", "arbitrary"),
            vmem_limit_bytes=vmem_limit),
        cost_estimate=cost,
    )(adj_p, feat_p, normr_p)

    return out_p[:n_dst, :f].astype(feat.dtype)


def im_attention(adj, feat, *, block_dst=512, block_src=512, block_feat=2048,
                 matmul_dtype=jnp.bfloat16):
    """One-shot forward (IMAttention).  adj: (N, N) dense 0/1 adjacency,
    adj[dst, src] = 1 iff edge src->dst; feat: (N, F).  For training loops
    with a static graph, call prepare_graph() once and then
    im_attention_prepared() per step to skip the per-graph work."""
    return im_attention_prepared(prepare_graph(adj), feat, block_dst=block_dst,
                                 block_src=block_src, block_feat=block_feat,
                                 matmul_dtype=matmul_dtype)


def im_attention_ref(adj, feat):
    """Pure-JAX reference mirroring the PyTorch/DGL forward (f32)."""
    deg_o = jnp.maximum(jnp.sum(adj, axis=0), 1.0)   # out-degrees (per source)
    deg_i = jnp.maximum(jnp.sum(adj, axis=1), 1.0)   # in-degrees  (per dest)
    h = feat * (deg_o ** -0.5)[:, None]
    rst = adj @ h                                    # copy_u + sum to dst
    return rst * (deg_i ** -0.5)[:, None]


# TODO(synk): a true sparse (CSR edge-list) update_all has no clean dense-block
# Pallas equivalent here; the graph is represented as a dense 0/1 adjacency.

if __name__ == "__main__":
    key = jax.random.PRNGKey(0)
    k1, k2, k3, k4, k5, k6 = jax.random.split(key, 6)

    # --- small graph: N=16 nodes, 48-dim features ---------------------------
    N, F = 16, 48
    adj = (jax.random.uniform(k1, (N, N)) < 0.4).astype(jnp.float32)
    feat = jax.random.normal(k2, (N, F), dtype=jnp.float32)
    ref = im_attention_ref(adj, feat)

    # f32 MXU path (tight semantics check).
    out_f32 = jax.block_until_ready(
        im_attention(adj, feat, block_dst=16, block_src=128, block_feat=128,
                     matmul_dtype=jnp.float32))
    assert out_f32.shape == (N, F)
    assert jnp.allclose(out_f32, ref, atol=1e-4, rtol=1e-4)

    # bf16 MXU path (default): adj exact as int8->bf16, f32 accumulation.
    out_bf16 = jax.block_until_ready(
        im_attention(adj, feat, block_dst=16, block_src=128, block_feat=128))
    assert jnp.allclose(out_bf16, ref, atol=5e-2, rtol=5e-2)

    # --- multi-tile dst / src-reduction / feat tiles -------------------------
    N2, F2 = 160, 256
    adj2 = (jax.random.uniform(k3, (N2, N2)) < 0.1).astype(jnp.float32)
    feat2 = jax.random.normal(k4, (N2, F2), dtype=jnp.float32)
    ref2 = im_attention_ref(adj2, feat2)
    out2 = jax.block_until_ready(
        im_attention(adj2, feat2, block_dst=64, block_src=128, block_feat=128))
    assert out2.shape == (N2, F2)
    assert jnp.allclose(out2, ref2, atol=5e-2, rtol=5e-2)

    # --- default (large) tiles + cached prepared-graph path ------------------
    N3, F3 = 512, 256
    adj3 = (jax.random.uniform(k5, (N3, N3)) < 0.05).astype(jnp.float32)
    feat3 = jax.random.normal(k6, (N3, F3), dtype=jnp.float32)
    ref3 = im_attention_ref(adj3, feat3)
    graph3 = prepare_graph(adj3)          # per-graph work done once, reused
    out3 = jax.block_until_ready(im_attention_prepared(graph3, feat3))
    assert out3.shape == (N3, F3)
    assert jnp.allclose(out3, ref3, atol=5e-2, rtol=5e-2)

    print("KERNEL_OK")
</pallas_src>

<mosaic_0001>
module attributes {stable_mosaic.version = 11 : i64} {
  func.func @im_attention_kernel(%arg0: i32, %arg1: i32, %arg2: i32, %arg3: memref<16x128xi8, #tpu.memory_space<vmem>>, %arg4: memref<128x128xf32, #tpu.memory_space<vmem>>, %arg5: memref<16x1xf32, #tpu.memory_space<vmem>>, %arg6: memref<16x128xf32, #tpu.memory_space<vmem>>) attributes {dimension_semantics = [#tpu.dimension_semantics<parallel>, #tpu.dimension_semantics<parallel>, #tpu.dimension_semantics<arbitrary>], iteration_bounds = array<i64: 1, 1, 1>, scalar_prefetch = 0 : i64, scratch_operands = 0 : i64, tpu.core_type = #tpu.core_type<tc>, window_params = [{transform_indices = @transform_0, window_bounds = array<i64: 16, 128>}, {transform_indices = @transform_1, window_bounds = array<i64: 128, 128>}, {transform_indices = @transform_2, window_bounds = array<i64: 16, 1>}, {transform_indices = @transform_3, window_bounds = array<i64: 16, 128>}]} {
    %c0 = arith.constant 0 : index
    %c0_0 = arith.constant 0 : index
    %0 = vector.load %arg3[%c0, %c0_0] : memref<16x128xi8, #tpu.memory_space<vmem>>, vector<16x128xi8>
    %1 = arith.sitofp %0 : vector<16x128xi8> to vector<16x128xf32>
    %c0_1 = arith.constant 0 : index
    %c0_2 = arith.constant 0 : index
    %2 = vector.load %arg4[%c0_1, %c0_2] : memref<128x128xf32, #tpu.memory_space<vmem>>, vector<128x128xf32>
    %cst = arith.constant dense<0.000000e+00> : vector<16x128xf32>
    %3 = tpu.matmul %1, %2, %cst {dimension_numbers = #tpu.dot_dimension_numbers<[1], [0], [0], [1], [0, 0, 1, 1], [], []>} : vector<16x128xf32>, vector<128x128xf32>, vector<16x128xf32> -> vector<16x128xf32>
    %c0_i32 = arith.constant 0 : i32
    %4 = arith.cmpi eq, %arg2, %c0_i32 : i32
    %5 = arith.extui %4 : i1 to i32
    %c0_i32_3 = arith.constant 0 : i32
    %6 = arith.cmpi ne, %5, %c0_i32_3 : i32
    scf.if %6 {
      %c0_8 = arith.constant 0 : index
      %c0_9 = arith.constant 0 : index
      %13 = vector.load %arg6[%c0_8, %c0_9] : memref<16x128xf32, #tpu.memory_space<vmem>>, vector<16x128xf32>
      tpu.vector_store %arg6[%c0_8, %c0_9], %3 {strides = array<i32>} : memref<16x128xf32, #tpu.memory_space<vmem>>, vector<16x128xf32>,
    } else {
    }
    %c0_i32_4 = arith.constant 0 : i32
    %7 = arith.cmpi sgt, %arg2, %c0_i32_4 : i32
    %8 = arith.extui %7 : i1 to i32
    %c0_i32_5 = arith.constant 0 : i32
    %9 = arith.cmpi ne, %8, %c0_i32_5 : i32
    scf.if %9 {
      %c0_8 = arith.constant 0 : index
      %c0_9 = arith.constant 0 : index
      %13 = vector.load %arg6[%c0_8, %c0_9] : memref<16x128xf32, #tpu.memory_space<vmem>>, vector<16x128xf32>
      %14 = arith.addf %13, %3 : vector<16x128xf32>
      %c0_10 = arith.constant 0 : index
      %c0_11 = arith.constant 0 : index
      %15 = vector.load %arg6[%c0_10, %c0_11] : memref<16x128xf32, #tpu.memory_space<vmem>>, vector<16x128xf32>
      tpu.vector_store %arg6[%c0_10, %c0_11], %14 {strides = array<i32>} : memref<16x128xf32, #tpu.memory_space<vmem>>, vector<16x128xf32>,
    } else {
    }
    %c0_i32_6 = arith.constant 0 : i32
    %10 = arith.cmpi eq, %arg2, %c0_i32_6 : i32
    %11 = arith.extui %10 : i1 to i32
    %c0_i32_7 = arith.constant 0 : i32
    %12 = arith.cmpi ne, %11, %c0_i32_7 : i32
    scf.if %12 {
      %c0_8 = arith.constant 0 : index
      %c0_9 = arith.constant 0 : index
      %13 = vector.load %arg6[%c0_8, %c0_9] : memref<16x128xf32, #tpu.memory_space<vmem>>, vector<16x128xf32>
      %c0_10 = arith.constant 0 : index
      %c0_11 = arith.constant 0 : index
      %14 = vector.load %arg5[%c0_10, %c0_11] : memref<16x1xf32, #tpu.memory_space<vmem>>, vector<16x1xf32>
      %15 = vector.broadcast %14 : vector<16x1xf32> to vector<16x128xf32>
      %16 = arith.mulf %13, %15 : vector<16x128xf32>
      %c0_12 = arith.constant 0 : index
      %c0_13 = arith.constant 0 : index
      %17 = vector.load %arg6[%c0_12, %c0_13] : memref<16x128xf32, #tpu.memory_space<vmem>>, vector<16x128xf32>
      tpu.vector_store %arg6[%c0_12, %c0_13], %16 {strides = array<i32>} : memref<16x128xf32, #tpu.memory_space<vmem>>, vector<16x128xf32>,
    } else {
    }
    return
  }
  func.func @transform_0(%arg0: i32, %arg1: i32, %arg2: i32) -> (i32, i32) {
    %c0_i32 = arith.constant 0 : i32
    return %arg0, %arg2 : i32, i32
  }
  func.func @transform_1(%arg0: i32, %arg1: i32, %arg2: i32) -> (i32, i32) {
    %c0_i32 = arith.constant 0 : i32
    return %arg2, %arg1 : i32, i32
  }
  func.func @transform_2(%arg0: i32, %arg1: i32, %arg2: i32) -> (i32, i32) {
    %c0_i32 = arith.constant 0 : i32
    %c0_i32_0 = arith.constant 0 : i32
    return %arg0, %c0_i32 : i32, i32
  }
  func.func @transform_3(%arg0: i32, %arg1: i32, %arg2: i32) -> (i32, i32) {
    %c0_i32 = arith.constant 0 : i32
    return %arg0, %arg1 : i32, i32
  }
}

</mosaic_0001>

<bundles_post_ra>
// kernel: tpu_custom_call.1
= control target key start
LH: loop header
LB: loop body
LE: loop exit
PB: predicated region body
PF: predicated region fallthrough
CT: control target
= control target key end

     0   :  { %8 = vsyncpa [#allocation3], 0  ;;  %s256_s0 = inlined_call_operand.vmem [shape: s8[16,128], index: 0, kind: input, shape index: {}]   ;;  %s257_s1 = inlined_call_operand.hbm [shape: f32[128,128], index: 1, kind: input, shape index: {}]   ;;  %s258_s2 = inlined_call_operand.vmem [shape: f32[16,1], index: 2, kind: input, shape index: {}]   ;;  %s259_s3 = inlined_call_operand.hbm [shape: f32[16,128], index: 3, kind: output, shape index: {}]  }
   0x1   :  { %9 = vsyncpa [#allocation4], 0  ;;  %s16_s14 = sshll.u32 %s257_s1, 4  ;;  %s210_s15 = smov [#allocation2]   ;;  %s17_s14 = int_to_ptr.hbm [resolvable:$true] %s16_s14 }
   0x2   :  { %s18_s16 = sshll.u32 %s210_s15, 4  ;;  %s211_s17 = smov 128   ;;  %s19_s16 = int_to_ptr.vmem [resolvable:$true] %s18_s16 }
   0x3   :  { %s212_s18 = smov 8  }
   0x4   :  { %24 = dma.hbm_to_vmem [thread:$0]  %s17_s14, 2048, %s19_s16, [#allocation3], %s211_s17, %s211_s17, %s212_s18  }
   0x5   :  { %206 = dma.done.wait [#allocation3], 2048  }
   0x6   :  { %207 = vsyncadd [#allocation3], 4294965248  ;;  %v213_v0 = vmov 0   ;;  %v52_v1 = vld [vmem:[#allocation2 + $0x78] sm:$0xff]  ;;  %v51_v2 = vld [vmem:[#allocation2 + $0x70] sm:$0xff]  ;;  %s119_s26 = sshll.u32 %s259_s3, 4  ;;  %s120_s26 = int_to_ptr.hbm [resolvable:$true] %s119_s26 }
   0x7   :  { %157 = vset.pattern.permute.xlu0 %v213_v0  ;;  %53 = vmatpush.msra.mxu0 %v52_v1  ;;  %v50_v3 = vld [vmem:[#allocation2 + $0x68] sm:$0xff]  ;;  %v49_v4 = vld [vmem:[#allocation2 + $0x60] sm:$0xff]  ;;  %v48_v6 = vld [vmem:[#allocation2 + $0x58] sm:$0xff] }
   0x8   :  { %136 = vmatpush.msra.mxu1 %v52_v1  ;;  %v97_v5 = vld [vmem:[%s258_s2] sm:$0xff]  ;;  %v47_v7 = vld [vmem:[#allocation2 + $0x50] sm:$0xff]  ;;  %v46_v8 = vld [vmem:[#allocation2 + $0x48] sm:$0xff] }
   0x9   :  { %54 = vmatpush.msra.mxu0 %v51_v2  ;;  %101 = vperm.xlu0 %157, %v97_v5   ;;  %v98_v9 = vld [vmem:[%s258_s2 + $0x8] sm:$0xff]  ;;  %v45_v10 = vld [vmem:[#allocation2 + $0x40] sm:$0xff]  ;;  %v44_v11 = vld [vmem:[#allocation2 + $0x38] sm:$0xff] }
   0xa   :  { %137 = vmatpush.msra.mxu1 %v51_v2  ;;  %v43_v12 = vld [vmem:[#allocation2 + $0x30] sm:$0xff]  ;;  %v42_v13 = vld [vmem:[#allocation2 + $0x28] sm:$0xff]  ;;  %v41_v14 = vld [vmem:[#allocation2 + $0x20] sm:$0xff] }
   0xb   :  { %55 = vmatpush.msra.mxu0 %v50_v3  ;;  %v133_v15 = vld [vmem:[%s256_s0] sm:$0xf]   ;;  %v40_v16 = vld [vmem:[#allocation2 + $0x18] sm:$0xff]  ;;  %v39_v17 = vld [vmem:[#allocation2 + $0x10] sm:$0xff]  ;;  %s214_s0 = smov [#allocation5]  }
   0xc   :  { %138 = vmatpush.msra.mxu1 %v50_v3  ;;  %v134_v18 = vunpack.c.0.s8 %v133_v15  ;;  %v135_v19 = vunpack.c.1.s8 %v133_v15  ;;  %v38_v20 = vld [vmem:[#allocation2 + $0x8] sm:$0xff]  ;;  %v37_v21 = vld [vmem:[#allocation2] sm:$0xff]  ;;  %s117_s2 = sshll.u32 %s214_s0, 4  ;;  %s118_s2 = int_to_ptr.vmem [resolvable:$true] %s117_s2 }
   0xd   :  { %56 = vmatpush.msra.mxu0 %v49_v4 }
   0xe   :  { %139 = vmatpush.msra.mxu1 %v49_v4  ;;  %v35_v22 = vcvt.s32.f32 %v134_v18  ;;  %v36_v23 = vcvt.s32.f32 %v135_v19 }
   0xf   :  { %57 = vmatpush.msra.mxu0 %v48_v6 }
  0x10   :  { %140 = vmatpush.msra.mxu1 %v48_v6 }
  0x11   :  { %58 = vmatpush.msra.mxu0 %v47_v7  ;;  %106 = vperm.xlu0 %157, %v98_v9  }
  0x12   :  { %141 = vmatpush.msra.mxu1 %v47_v7 }
  0x13   :  { %59 = vmatpush.msra.mxu0 %v46_v8 }
  0x14   :  { %142 = vmatpush.msra.mxu1 %v46_v8 }
  0x15   :  { %60 = vmatpush.msra.mxu0 %v45_v10 }
  0x16   :  { %143 = vmatpush.msra.mxu1 %v45_v10 }
  0x17   :  { %61 = vmatpush.msra.mxu0 %v44_v11 }
  0x18   :  { %144 = vmatpush.msra.mxu1 %v44_v11 }
  0x19   :  { %62 = vmatpush.msra.mxu0 %v43_v12 }
  0x1a   :  { %145 = vmatpush.msra.mxu1 %v43_v12 }
  0x1b   :  { %63 = vmatpush.msra.mxu0 %v42_v13 }
  0x1c   :  { %146 = vmatpush.msra.mxu1 %v42_v13 }
  0x1d   :  { %64 = vmatpush.msra.mxu0 %v41_v14 }
  0x1e   :  { %147 = vmatpush.msra.mxu1 %v41_v14 }
  0x1f   :  { %65 = vmatpush.msra.mxu0 %v40_v16 }
  0x20   :  { %148 = vmatpush.msra.mxu1 %v40_v16 }
  0x21   :  { %66 = vmatpush.msra.mxu0 %v39_v17 }
  0x22   :  { %149 = vmatpush.msra.mxu1 %v39_v17 }
  0x23   :  { %67 = vmatpush.msra.mxu0 %v38_v20 }
  0x24   :  { %150 = vmatpush.msra.mxu1 %v38_v20 }
  0x25   :  { %68 = vmatpush.msra.mxu0 %v37_v21 }
  0x26   :  { %151 = vmatpush.msra.mxu1 %v37_v21  ;;  %69 = vmatmul.f32.vlgmr.msra.gmra.mxu0 %v35_v22 }
  0x27   :  { %72 = vmatmul.f32.vlgmr.msra.gmra.mxu1 %v36_v23 }
  0x7b   :  { %v102_v24 = vpop.permute.xlu0 %101 }
  0x83   :  { %v107_v25 = vpop.permute.xlu0 %106 }
  0xa3   :  { %v70_v26 = vpop.f32.mrf.mxu0 }
  0xa4   :  { %v73_v27 = vpop.f32.mrf.mxu1  ;;  %v109_v28 = vmul.f32 %v102_v24, %v70_v26 }
  0xa5   :  { %v110_v29 = vmul.f32 %v107_v25, %v73_v27 }
  0xa6   :  { %111 = vst [vmem:[#allocation5] sm:$0xff] %v109_v28 }
  0xa7   :  { %112 = vst [vmem:[#allocation5 + $0x8] sm:$0xff] %v110_v29 }
  0xa8   :  { %125 = dma.vmem_to_hbm [thread:$0]  %s118_s2, 256, %s120_s26, [#allocation4], %s211_s17, %s211_s17, %s212_s18  }
  0xa9   :  { %208 = dma.done.wait [#allocation4], 256  }
  0xaa   :  { %209 = vsyncadd [#allocation4], 4294967040 }
  0xab   :  { %130 = vsyncpa [#allocation3], 1 }
  0xac   :  { %131 = vsyncpa [#allocation4], 1 }

</bundles_post_ra>
